<compile_context>
chip_gen: v5e
topology: v5e:2x2
jax: 0.10.0
libtpu: 0.0.40
codegen_flags: <defaults>
</compile_context>

<pallas_src>
import functools

import jax
import jax.numpy as jnp
from jax.experimental import pallas as pl
from jax.experimental.pallas import tpu as pltpu


# ---------------------------------------------------------------------------
# Kernels
# ---------------------------------------------------------------------------

def _se_fused_kernel(x_ref, wd_ref, bd_ref, wu_ref, bu_ref, o_ref):
    """Pool + gate + scale for a (TB, C, HW) batch tile (whole image resident)."""
    x = x_ref[...]                                        # (TB, C, HW), input dtype
    # Global average pool: f32-accumulated sum; the 1/HW factor is folded into
    # wd_ref by the wrapper, so no (TB, C) rescale is needed here.
    s = jnp.sum(x, axis=2, dtype=jnp.float32)             # (TB, C)
    h = jnp.dot(s, wd_ref[...], preferred_element_type=jnp.float32) + bd_ref[...]
    h = jnp.maximum(h, 0.0)                               # (TB, INT)
    g = jnp.dot(h, wu_ref[...], preferred_element_type=jnp.float32) + bu_ref[...]
    g = jax.nn.sigmoid(g)                                 # (TB, C)
    # Keep the dominant multiply + store in the input dtype (no full-tile upcast).
    o_ref[...] = x * g.astype(x.dtype)[:, :, None]


def _se_pool_gate_kernel(x_ref, wd_ref, bd_ref, wu_ref, bu_ref, g_ref, acc_ref,
                         *, hw, thw):
    """Phase 1: accumulate the spatial sum over HW chunks; emit the gate at the end."""
    h_idx = pl.program_id(1)

    @pl.when(h_idx == 0)
    def _():
        acc_ref[...] = jnp.zeros_like(acc_ref)

    x = x_ref[...]                                        # (1, C, THW)
    if hw % thw:                                          # mask the ragged tail chunk
        lane = jax.lax.broadcasted_iota(jnp.int32, x.shape, 2)
        x = jnp.where(h_idx * thw + lane < hw, x, jnp.zeros_like(x))
    acc_ref[...] += jnp.sum(x, axis=2, dtype=jnp.float32)  # (1, C) f32 sums

    @pl.when(h_idx == pl.num_programs(1) - 1)
    def _():
        s = acc_ref[...]                                  # (1, C)
        h = jnp.dot(s, wd_ref[...], preferred_element_type=jnp.float32) + bd_ref[...]
        h = jnp.maximum(h, 0.0)                           # (1, INT)
        g = jnp.dot(h, wu_ref[...], preferred_element_type=jnp.float32) + bu_ref[...]
        g = jax.nn.sigmoid(g)                             # (1, C)
        g_ref[...] = g[:, :, None]                        # (1, C, 1)


def _se_scale_kernel(x_ref, g_ref, o_ref):
    """Phase 2: out = x * gate, tiled over (batch, HW chunks)."""
    x = x_ref[...]                                        # (1, C, THW)
    o_ref[...] = x * g_ref[...].astype(x.dtype)           # gate block is (1, C, 1)


# ---------------------------------------------------------------------------
# Tiling / VMEM sizing helpers
# ---------------------------------------------------------------------------

def _vmem_budget_bytes():
    """~3/4 of per-core VMEM (queried; conservative 64 MiB v7x fallback)."""
    cap = 64 << 20
    try:
        cap = int(getattr(pltpu.get_tpu_info(), "vmem_capacity_bytes", cap))
    except Exception:
        pass
    return (3 * cap) // 4


def _pick_batch_block(n, per_batch_bytes, target_bytes, min_steps=4):
    """Batch elems per fused grid step: block <= target, >= min_steps steps, divides N."""
    tb = max(1, min(n, target_bytes // max(per_batch_bytes, 1)))
    tb = min(tb, max(1, n // min(n, min_steps)))
    while n % tb:
        tb -= 1
    return tb


def _pick_hw_chunk(hw, c, itemsize, target_bytes, min_chunks=4):
    """Spatial chunk for the two-phase path: lane-dense (multiple of 128), block
    <= target, and >= min_chunks chunks so the pipeline / both cores stay fed."""
    max_elems = max(1, target_bytes // max(c * itemsize, 1))
    thw = min(hw, max_elems, pl.cdiv(hw, min_chunks))
    if thw >= 128:
        thw = (thw // 128) * 128
    else:
        # Not worth tiling (tiny HW), or C so large that even 128 lanes
        # overshoots the target: fall back to the full spatial extent.
        # TODO(synk): for huge-C / tiny-HW stages, tile the channel axis instead.
        thw = hw
    return thw


# ---------------------------------------------------------------------------
# Wrapper
# ---------------------------------------------------------------------------

def se_block(x_nchw, w_down, b_down, w_up, b_up, *, two_phase=None):
    """x_nchw: (N, C, H, W); w_down: (INT, C); w_up: (C, INT) (collapsed 1x1-conv weights)."""
    N, C, H, W = x_nchw.shape
    INT = w_down.shape[0]
    assert H == W, "SEBlock uses avg_pool2d(kernel_size=W); requires square spatial dims"
    HW = H * W

    # Consume NCHW directly: reshaping a contiguous array is free, so the kernel
    # touches HBM exactly once for the read and once for the write.
    # TODO(synk): for stages with HW < 128 the store lane width is HW (masked
    # vst); an in-kernel (C, HW)<->(HW, C) swap could make it lane-dense without
    # touching the HBM layout, but the kernel stays HBM-bound either way.
    x3 = x_nchw.reshape(N, C, HW)
    itemsize = x3.dtype.itemsize
    slab_bytes = C * HW * itemsize              # one image's (C, HW) slab

    budget = _vmem_budget_bytes()
    target_block = min(8 << 20, budget // 6)
    weight_bytes = (2 * C * INT + INT + C) * 4

    # Gate weights as row-vector @ matrix operands (f32); fold the 1/HW of the
    # global average pool into the down projection so the kernel only sums.
    wd_t = (jnp.transpose(w_down) * (1.0 / HW)).astype(jnp.float32)   # (C, INT)
    wu_t = jnp.transpose(w_up).astype(jnp.float32)                    # (INT, C)
    bd = b_down.reshape(1, INT).astype(jnp.float32)
    bu = b_up.reshape(1, C).astype(jnp.float32)

    if two_phase is None:
        # Two-phase when one image's slab would blow the VMEM budget, or when N
        # is too small for the fused grid to pipeline / feed both v7x cores.
        two_phase = slab_bytes > target_block or (N < 4 and slab_bytes > (2 << 20))

    if not two_phase:
        # ---- Fused path: pool + gate + scale in one grid step per batch tile.
        tb = _pick_batch_block(N, slab_bytes, target_block)
        block_bytes = tb * slab_bytes
        vmem_limit = int(min(budget, max(16 << 20,
                                         4 * block_bytes + 2 * weight_bytes + (4 << 20))))
        out = pl.pallas_call(
            _se_fused_kernel,
            out_shape=jax.ShapeDtypeStruct((N, C, HW), x3.dtype),
            grid_spec=pltpu.PrefetchScalarGridSpec(
                num_scalar_prefetch=0,
                grid=(N // tb,),
                in_specs=[
                    pl.BlockSpec((tb, C, HW), lambda n: (n, 0, 0)),
                    pl.BlockSpec((C, INT), lambda n: (0, 0)),   # resident weights
                    pl.BlockSpec((1, INT), lambda n: (0, 0)),
                    pl.BlockSpec((INT, C), lambda n: (0, 0)),
                    pl.BlockSpec((1, C), lambda n: (0, 0)),
                ],
                out_specs=pl.BlockSpec((tb, C, HW), lambda n: (n, 0, 0)),
            ),
            compiler_params=pltpu.CompilerParams(
                dimension_semantics=("parallel",),
                vmem_limit_bytes=vmem_limit,
            ),
        )(x3, wd_t, bd, wu_t, bu)
        return out.reshape(N, C, H, W)

    # ---- Two-phase path: spatially tiled pool+gate, then spatially tiled scale.
    chunk_target = min(4 << 20, budget // 12)
    thw = _pick_hw_chunk(HW, C, itemsize, chunk_target)
    hc = pl.cdiv(HW, thw)
    chunk_bytes = C * thw * itemsize
    vmem_limit = int(min(budget, max(16 << 20,
                                     4 * chunk_bytes + 2 * weight_bytes + (4 << 20))))

    gate = pl.pallas_call(
        functools.partial(_se_pool_gate_kernel, hw=HW, thw=thw),
        out_shape=jax.ShapeDtypeStruct((N, C, 1), jnp.float32),
        grid_spec=pltpu.PrefetchScalarGridSpec(
            num_scalar_prefetch=0,
            grid=(N, hc),
            in_specs=[
                pl.BlockSpec((1, C, thw), lambda n, h: (n, 0, h)),
                pl.BlockSpec((C, INT), lambda n, h: (0, 0)),
                pl.BlockSpec((1, INT), lambda n, h: (0, 0)),
                pl.BlockSpec((INT, C), lambda n, h: (0, 0)),
                pl.BlockSpec((1, C), lambda n, h: (0, 0)),
            ],
            out_specs=pl.BlockSpec((1, C, 1), lambda n, h: (n, 0, 0)),
            scratch_shapes=[pltpu.VMEM((1, C), jnp.float32)],
        ),
        compiler_params=pltpu.CompilerParams(
            dimension_semantics=("parallel", "arbitrary"),
            vmem_limit_bytes=vmem_limit,
        ),
    )(x3, wd_t, bd, wu_t, bu)

    out = pl.pallas_call(
        _se_scale_kernel,
        out_shape=jax.ShapeDtypeStruct((N, C, HW), x3.dtype),
        grid_spec=pltpu.PrefetchScalarGridSpec(
            num_scalar_prefetch=0,
            grid=(N, hc),
            in_specs=[
                pl.BlockSpec((1, C, thw), lambda n, h: (n, 0, h)),
                pl.BlockSpec((1, C, 1), lambda n, h: (n, 0, 0)),
            ],
            out_specs=pl.BlockSpec((1, C, thw), lambda n, h: (n, 0, h)),
        ),
        compiler_params=pltpu.CompilerParams(
            dimension_semantics=("parallel", "parallel"),
            vmem_limit_bytes=vmem_limit,
        ),
    )(x3, gate)
    return out.reshape(N, C, H, W)


# ---------------------------------------------------------------------------
# Reference + tests
# ---------------------------------------------------------------------------

def _reference(x, w_down, b_down, w_up, b_up):
    # Pure-JAX reference matching the PyTorch forward.
    s = jnp.mean(x, axis=(2, 3))                                           # (N, C)
    s = jnp.maximum(
        jnp.dot(s, w_down.T, precision=jax.lax.Precision.HIGHEST) + b_down, 0.0)
    s = jax.nn.sigmoid(
        jnp.dot(s, w_up.T, precision=jax.lax.Precision.HIGHEST) + b_up)    # (N, C)
    return x * s[:, :, None, None]


def _run_case(key, N, C, INT, H, W, tol, two_phase=None):
    kx, kwd, kbd, kwu, kbu = jax.random.split(key, 5)
    x = jax.random.normal(kx, (N, C, H, W), dtype=jnp.float32)
    # Conv2d 1x1 weights collapsed to 2D.
    w_down = 0.1 * jax.random.normal(kwd, (INT, C), dtype=jnp.float32)
    b_down = 0.1 * jax.random.normal(kbd, (INT,), dtype=jnp.float32)
    w_up = 0.1 * jax.random.normal(kwu, (C, INT), dtype=jnp.float32)
    b_up = 0.1 * jax.random.normal(kbu, (C,), dtype=jnp.float32)

    out = jax.block_until_ready(
        se_block(x, w_down, b_down, w_up, b_up, two_phase=two_phase))
    ref = _reference(x, w_down, b_down, w_up, b_up)
    assert out.shape == x.shape
    err = float(jnp.max(jnp.abs(out - ref)))
    assert err <= tol, f"mismatch vs reference: max abs err {err} > {tol}"


if __name__ == "__main__":
    key = jax.random.PRNGKey(0)
    k1, k2, k3, k4 = jax.random.split(key, 4)
    # Small stage: fused path, NCHW consumed directly (no HBM transpose).
    _run_case(k1, N=2, C=4, INT=2, H=16, W=16, tol=2e-3)
    # SE-style large-C / small-spatial stage: fused path, full-dim blocks.
    _run_case(k2, N=2, C=256, INT=16, H=4, W=4, tol=2e-3)
    # N=1 with a non-128-divisible spatial extent, forced through the two-phase
    # (spatially tiled) path to exercise accumulation + ragged-tail masking.
    _run_case(k3, N=1, C=8, INT=4, H=24, W=24, tol=2e-3, two_phase=True)
    # Batched case exercising tb > 1 block selection and >= 4 fused grid steps.
    _run_case(k4, N=8, C=16, INT=8, H=8, W=8, tol=2e-3)
    print("KERNEL_OK")
</pallas_src>

<mosaic_0001>
module attributes {stable_mosaic.version = 11 : i64} {
  func.func @_se_fused_kernel(%arg0: i32, %arg1: memref<1x4x256xf32, #tpu.memory_space<vmem>>, %arg2: memref<4x2xf32, #tpu.memory_space<vmem>>, %arg3: memref<1x2xf32, #tpu.memory_space<vmem>>, %arg4: memref<2x4xf32, #tpu.memory_space<vmem>>, %arg5: memref<1x4xf32, #tpu.memory_space<vmem>>, %arg6: memref<1x4x256xf32, #tpu.memory_space<vmem>>) attributes {dimension_semantics = [#tpu.dimension_semantics<parallel>], iteration_bounds = array<i64: 2>, scalar_prefetch = 0 : i64, scratch_operands = 0 : i64, tpu.core_type = #tpu.core_type<tc>, window_params = [{transform_indices = @transform_0, window_bounds = array<i64: 1, 4, 256>}, {pipeline_mode = #tpu.pipeline_mode<synchronous>, transform_indices = @transform_1, window_bounds = array<i64: 4, 2>}, {pipeline_mode = #tpu.pipeline_mode<synchronous>, transform_indices = @transform_2, window_bounds = array<i64: 1, 2>}, {pipeline_mode = #tpu.pipeline_mode<synchronous>, transform_indices = @transform_3, window_bounds = array<i64: 2, 4>}, {pipeline_mode = #tpu.pipeline_mode<synchronous>, transform_indices = @transform_4, window_bounds = array<i64: 1, 4>}, {transform_indices = @transform_5, window_bounds = array<i64: 1, 4, 256>}]} {
    %c0 = arith.constant 0 : index
    %c0_0 = arith.constant 0 : index
    %c0_1 = arith.constant 0 : index
    %0 = vector.load %arg1[%c0, %c0_0, %c0_1] : memref<1x4x256xf32, #tpu.memory_space<vmem>>, vector<1x4x256xf32>
    %cst = arith.constant dense<0.000000e+00> : vector<1x4xf32>
    %1 = vector.multi_reduction <add>, %0, %cst [2] : vector<1x4x256xf32> to vector<1x4xf32>
    %c0_2 = arith.constant 0 : index
    %c0_3 = arith.constant 0 : index
    %2 = vector.load %arg2[%c0_2, %c0_3] : memref<4x2xf32, #tpu.memory_space<vmem>>, vector<4x2xf32>
    %cst_4 = arith.constant dense<0.000000e+00> : vector<1x2xf32>
    %3 = tpu.matmul %1, %2, %cst_4 {dimension_numbers = #tpu.dot_dimension_numbers<[1], [0], [0], [1], [0, 0, 1, 1], [], []>} : vector<1x4xf32>, vector<4x2xf32>, vector<1x2xf32> -> vector<1x2xf32>
    %c0_5 = arith.constant 0 : index
    %c0_6 = arith.constant 0 : index
    %4 = vector.load %arg3[%c0_5, %c0_6] : memref<1x2xf32, #tpu.memory_space<vmem>>, vector<1x2xf32>
    %5 = arith.addf %3, %4 : vector<1x2xf32>
    %cst_7 = arith.constant 0.000000e+00 : f32
    %6 = vector.broadcast %cst_7 : f32 to vector<1x2xf32>
    %7 = arith.maximumf %5, %6 : vector<1x2xf32>
    %c0_8 = arith.constant 0 : index
    %c0_9 = arith.constant 0 : index
    %8 = vector.load %arg4[%c0_8, %c0_9] : memref<2x4xf32, #tpu.memory_space<vmem>>, vector<2x4xf32>
    %cst_10 = arith.constant dense<0.000000e+00> : vector<1x4xf32>
    %9 = tpu.matmul %7, %8, %cst_10 {dimension_numbers = #tpu.dot_dimension_numbers<[1], [0], [0], [1], [0, 0, 1, 1], [], []>} : vector<1x2xf32>, vector<2x4xf32>, vector<1x4xf32> -> vector<1x4xf32>
    %c0_11 = arith.constant 0 : index
    %c0_12 = arith.constant 0 : index
    %10 = vector.load %arg5[%c0_11, %c0_12] : memref<1x4xf32, #tpu.memory_space<vmem>>, vector<1x4xf32>
    %11 = arith.addf %9, %10 : vector<1x4xf32>
    %12 = arith.negf %11 : vector<1x4xf32>
    %13 = math.exp %12 : vector<1x4xf32>
    %cst_13 = arith.constant 1.000000e+00 : f32
    %14 = vector.broadcast %cst_13 : f32 to vector<1x4xf32>
    %15 = arith.addf %14, %13 : vector<1x4xf32>
    %16 = arith.divf %14, %15 : vector<1x4xf32>
    %17 = vector.shape_cast %16 : vector<1x4xf32> to vector<1x4x1xf32>
    %18 = vector.broadcast %17 : vector<1x4x1xf32> to vector<1x4x256xf32>
    %19 = arith.mulf %0, %18 : vector<1x4x256xf32>
    %c0_14 = arith.constant 0 : index
    %c0_15 = arith.constant 0 : index
    %c0_16 = arith.constant 0 : index
    %20 = vector.load %arg6[%c0_14, %c0_15, %c0_16] : memref<1x4x256xf32, #tpu.memory_space<vmem>>, vector<1x4x256xf32>
    tpu.vector_store %arg6[%c0_14, %c0_15, %c0_16], %19 {strides = array<i32>} : memref<1x4x256xf32, #tpu.memory_space<vmem>>, vector<1x4x256xf32>,
    return
  }
  func.func @transform_0(%arg0: i32) -> (i32, i32, i32) {
    %c0_i32 = arith.constant 0 : i32
    %c0_i32_0 = arith.constant 0 : i32
    %c0_i32_1 = arith.constant 0 : i32
    return %arg0, %c0_i32, %c0_i32_0 : i32, i32, i32
  }
  func.func @transform_1(%arg0: i32) -> (i32, i32) {
    %c0_i32 = arith.constant 0 : i32
    %c0_i32_0 = arith.constant 0 : i32
    %c0_i32_1 = arith.constant 0 : i32
    return %c0_i32, %c0_i32_0 : i32, i32
  }
  func.func @transform_2(%arg0: i32) -> (i32, i32) {
    %c0_i32 = arith.constant 0 : i32
    %c0_i32_0 = arith.constant 0 : i32
    %c0_i32_1 = arith.constant 0 : i32
    return %c0_i32, %c0_i32_0 : i32, i32
  }
  func.func @transform_3(%arg0: i32) -> (i32, i32) {
    %c0_i32 = arith.constant 0 : i32
    %c0_i32_0 = arith.constant 0 : i32
    %c0_i32_1 = arith.constant 0 : i32
    return %c0_i32, %c0_i32_0 : i32, i32
  }
  func.func @transform_4(%arg0: i32) -> (i32, i32) {
    %c0_i32 = arith.constant 0 : i32
    %c0_i32_0 = arith.constant 0 : i32
    %c0_i32_1 = arith.constant 0 : i32
    return %c0_i32, %c0_i32_0 : i32, i32
  }
  func.func @transform_5(%arg0: i32) -> (i32, i32, i32) {
    %c0_i32 = arith.constant 0 : i32
    %c0_i32_0 = arith.constant 0 : i32
    %c0_i32_1 = arith.constant 0 : i32
    return %arg0, %c0_i32, %c0_i32_0 : i32, i32, i32
  }
}

</mosaic_0001>

<bundles_post_ra>
// kernel: tpu_custom_call.1
= control target key start
LH: loop header
LB: loop body
LE: loop exit
PB: predicated region body
PF: predicated region fallthrough
CT: control target
= control target key end

     0   :  { %10 = vsyncpa [#allocation3], 0  ;;  %s785_s0 = inlined_call_operand.hbm [shape: f32[2,4,256], index: 0, kind: input, shape index: {}]   ;;  %s786_s1 = inlined_call_operand.vmem [shape: f32[4,2], index: 1, kind: input, shape index: {}]   ;;  %s787_s2 = inlined_call_operand.vmem [shape: f32[1,2], index: 2, kind: input, shape index: {}]   ;;  %s788_s3 = inlined_call_operand.vmem [shape: f32[2,4], index: 3, kind: input, shape index: {}]   ;;  %s789_s4 = inlined_call_operand.vmem [shape: f32[1,4], index: 4, kind: input, shape index: {}]   ;;  %s790_s5 = inlined_call_operand.hbm [shape: f32[2,4,256], index: 5, kind: output, shape index: {}]  }
   0x1   :  { %12 = vsyncpa [#allocation3 + $0x1], 0 }
   0x2   :  { %13 = vsyncpa [#allocation4], 0 }
   0x3   :  { %15 = vsyncpa [#allocation4 + $0x1], 0  ;;  %s642_s18 = smov 0   ;;  %s644_s19 = smov 0  }
   0x4   :  { %s646_s20 = smov 0   ;;  %s648_s21 = smov 0  }
   0x5 LB: > { %s663_s22 = sadd.s32 4294967295, %s609_s21   ;;  %s440_s23 = sadd.s32 4294967294, %s609_s21   ;;  %s609_s21 = sphi %s648_s21, %s800_s21   ;;  %s605_s20 = sphi %s646_s20, %s799_s20   ;;  %s601_s19 = sphi %s644_s19, %s798_s19   ;;  %s597_s18 = sphi %s642_s18, %s797_s18  }
   0x6   : > { %s667_s24 = sadd.s32 1, %s609_s21   ;;  %s28_s25 = sadd.s32 1, %s605_s20 }
   0x7   : > { %s25_s26 = ssub.s32 %s609_s21, %s667_s24  ;;  %p35_p0 = scmp.ne.s32.totalorder %s605_s20, %s601_s19 }
   0x8   : > { %p26_p1 = scmp.eq.s32.totalorder %s25_s26, 0  ;;  %p36_p2 = scmp.eq.s32.totalorder %s609_s21, 0 }
   0x9   : > { %p41_p3 = scmp.ne.s32.totalorder %s601_s19, %s597_s18  ;;  %p42_p4 = scmp.eq.s32.totalorder %s663_s22, 0 }
   0xa   : > { %s679_s27 = scalar_select %p26_p1, %s605_s20, %s28_s25  }
   0xb   : > { %p681_p5 = por %p36_p2, %p35_p0  ;;  %p685_p6 = por %p42_p4, %p41_p3 }
   0xc   : > { %p149_p7 = scmp.eq.s32.totalorder %s663_s22, 1  ;;  %p155_p8 = scmp.eq.s32.totalorder %s440_s23, 1 }
   0xd   : > { %p473_p10 = scmp.lt.s32.totalorder %s609_s21, 2  ;;  %s187_s7 = sand.u32 1, %s605_s20  }
   0xe   : > { %p692_p11 = por %p149_p7, %p35_p0  ;;  %p696_p12 = por %p155_p8, %p41_p3 }
   0xf   : > { %s459_s8 = sshll.u32 %s609_s21, 3  ;;  %s443_s9 = sshll.u32 %s187_s7, 3 }
  0x10   : > { %s196_s12 = scalar_lea.hbm %s785_s0, %s459_s8  ;;  %s191_s14 = scalar_lea.vmem [#allocation2], %s443_s9 }
  0x11   : > { %s198_s13 = sshll.u32 %s196_s12, 4  ;;  %s200_s15 = sshll.u32 %s191_s14, 4  ;;  %s199_s13 = int_to_ptr.hbm [resolvable:$true] %s198_s13  ;;  %s201_s15 = int_to_ptr.vmem [resolvable:$true] %s200_s15 }
  0x12   : > { %p707_p13 = pnand %p473_p10, %p681_p5  ;;  %p446_p0 = scmp.ge.s32.totalorder %s609_s21, 1 }
  0x13   : > { %p205_p1 = scmp.lt.s32.totalorder %s609_s21, 3  ;;  %s188_s17 = scalar_lea.sflag [#allocation3], %s187_s7 }
  0x14   : > { %s513_s23 = sshra.s32 %s199_s13, 4  ;;  %p517_p3 = pneg %p707_p13  ;;  %s514_s23 = int_to_ptr.hbm [resolvable:$true] %s513_s23 }
  0x15   : > { %s515_s25 = scalar_lea.hbm %s514_s23, 8  ;;  %s520_s28 = scalar_lea.hbm %s785_s0, 16 }
  0x16   : > { %p516_p2 = scmp.ne.s32.totalorder %s514_s23, %s515_s25  ;;  %p521_p5 = scmp.lt.s32.totalorder %s514_s23, %s785_s0 }
  0x17   : > { %p522_p8 = scmp.lt.s32.totalorder %s520_s28, %s515_s25 }
  0x18   : > { %p518_p4 = pnand %p517_p3, %p516_p2 }
  0x19   : > { %p523_p10 = por %p522_p8, %p521_p5 }
  0x1a   : > { %p519_p7 = pneg %p518_p4 }
  0x1c   : > { %p524_p9 = pnand %p523_p10, %p519_p7 }
  0x1e   : > { %527 = shalt.err (!%p524_p9)
}
  0x1f   : > { %468 = dma.hbm_to_vmem [thread:$0]  (!%p707_p13), %s199_s13, 128, %s201_s15, %s188_s17  }
  0x20   : > { %p206_p2 = pnand %p446_p0, %p205_p1 }
  0x21   : > { %s728_s7 = sand.u32 (!%p206_p2), 1, %s601_s19  }
  0x22   : > { %209 = sbr.rel (%p206_p2) target bundleno = 580 (0x244), region = 40  ;;  %s447_s11 = sshll.u32 (!%p206_p2), %s728_s7, 3 }
  0x23   : > { %s212_s12 = scalar_lea.sflag (!%p206_p2), [#allocation3], %s728_s7  ;;  %s215_s14 = scalar_lea.vmem (!%p206_p2), [#allocation2], %s447_s11 }
  0x27   : > { %588 = dma.done.wait (%p685_p6), %s212_s12, 128  }
  0x28   : > { %590 = vsyncadd (%p685_p6), %s212_s12, 4294967168  ;;  %v243_v0 = vld [vmem:[%s215_s14] sm:$0xff]  ;;  %vm250_vm0 = vcmask 1043456   ;;  %v256_v6 = vld [vmem:[%s786_s1] sm:$0xf]  ;;  %v259_v7 = vlaneseq  ;;  %vm262_vm1 = vcmask 31744  }
  0x29   : > { %245 = vst [vmem:[#allocation1] ss:$2 sm:$0xff] %v243_v0  ;;  %449 = vmatpush.msk.msra.mxu0 %vm250_vm0, %v256_v6  ;;  %v289_v11 = vld [vmem:[%s788_s3] sm:$0x3]  ;;  %vm295_vm2 = vcmask 1041408   ;;  %vm291_vm3 = vcmask 15360  }
  0x2a   : > { %v260_v8 = vand.u32 127, %v259_v7  ;;  %451 = vmatpush.msk.msra.mxu1 %vm295_vm2, %v289_v11  ;;  %v257_v12 = vld [vmem:[%s787_s2] sm:$0x1]  ;;  %v340_v16 = vshrl.u32 %v259_v7, 7  ;;  %v611_v34 = vmov 839922192  }
  0x2b   : > { %v290_v17 = vld [vmem:[%s789_s4] sm:$0x1]  ;;  %v347_v35 = vunpack.c.l.s4 %v611_v34  ;;  %s460_s8 = sshll.u32 %s663_s22, 3  ;;  %s242_s12 = scalar_lea.vmem [#allocation5], %s447_s11 }
  0x2c   : > { %508 = vset.pattern.permute.xlu0 %v340_v16  ;;  %s365_s10 = scalar_lea.hbm %s790_s5, %s460_s8  ;;  %s367_s14 = sshll.u32 %s242_s12, 4  ;;  %s368_s14 = int_to_ptr.vmem [resolvable:$true] %s367_s14 }
  0x2d   : > { %v348_v36 = vunpack.c.0.s8 %v347_v35  ;;  %s369_s13 = sshll.u32 %s365_s10, 4  ;;  %s354_s15 = scalar_lea.sflag [#allocation4], %s728_s7  ;;  %s370_s13 = int_to_ptr.hbm [resolvable:$true] %s369_s13 }
  0x2e   : > { %s557_s29 = sshra.s32 %s370_s13, 4  ;;  %s563_s23 = scalar_lea.hbm %s790_s5, 16  ;;  %s558_s29 = int_to_ptr.hbm [resolvable:$true] %s557_s29 }
  0x2f   : > { %s559_s22 = scalar_lea.hbm %s558_s29, 8  ;;  %p564_p0 = scmp.lt.s32.totalorder %s558_s29, %s790_s5 }
  0x30   : > { %v246_v1 = vld.sshfl [vmem:[#allocation1] sm:$0xff pattern:$0x75316420]  ;;  %v247_v2 = vld.sshfl [vmem:[#allocation1 + $0x8] sm:$0xff pattern:$0x75316420]  ;;  %p560_p6 = scmp.ne.s32.totalorder %s558_s29, %s559_s22  ;;  %p565_p1 = scmp.lt.s32.totalorder %s563_s23, %s559_s22 }
  0x31   : > { %v251_v3 = vsel %vm250_vm0, %v246_v1, 0.0  ;;  %v252_v4 = vsel %vm250_vm0, %v247_v2, 0.0 }
  0x32   : > { %v253_v5 = vadd.f32 %v252_v4, %v251_v3  ;;  %p561_p9 = pnand %p560_p6, %p692_p11  ;;  %p566_p3 = por %p565_p1, %p564_p0 }
  0x34   : > { %254 = vadd.xlane.f32.xlu0 %v253_v5  ;;  %p562_p13 = pneg %p561_p9 }
  0x36   : > { %p567_p4 = pnand %p566_p3, %p562_p13 }
  0xa7   : > { %v255_v9 = vpop.xlane.xlu0 %254 }
  0xa8   : > { %v261_v10 = vperm.slane %v255_v9, %v260_v8 }
  0xaa   : > { %450 = vmatmul.msk.f32.vlgmr.msra.gmra.mxu0 %vm262_vm1, %v261_v10 }
 0x127   : > { %v285_v13 = vpop.f32.mrf.mxu0 }
 0x128   : > { %v286_v14 = vadd.f32 %v285_v13, %v257_v12 }
 0x12a   : > { %v288_v15 = vmax.f32 %v286_v14, 0.0 }
 0x12c   : > { %452 = vmatmul.msk.f32.vlgmr.msra.gmra.mxu1 %vm291_vm3, %v288_v15 }
 0x1a9   : > { %v316_v18 = vpop.f32.mrf.mxu1 }
 0x1aa   : > { %v317_v19 = vadd.f32 %v316_v18, %v290_v17 }
 0x1ac   : > { %v453_v20 = vmul.f32 -1.442695, %v317_v19 }
 0x1ae   : > { %509 = vpow2.f32 %v453_v20 }
 0x1b4   : > { %v510_v21 = vpop.eup %509 }
 0x1b5   : > { %v322_v22 = vadd.f32 1.0, %v510_v21 }
 0x1b7   : > { %511 = vrcp.f32 %v322_v22  ;;  %v334_v26 = vand.u32 2147483648, %v322_v22  ;;  %v332_v28 = vand.u32 2147483647, %v322_v22  ;;  %vm328_vm5 = vweird.f32 %v322_v22 }
 0x1b9   : > { %v335_v30 = vor.u32 1.1754944e-38, %v334_v26  ;;  %vm333_vm7 = vcmp.eq.f32.partialorder %v332_v28, 8.507059e+37 }
 0x1bd   : > { %v512_v23 = vpop.eup %511 }
 0x1be   : > { %v324_v24 = vmul.f32 %v512_v23, %v322_v22  ;;  %vm329_vm4 = vweird.f32 %v512_v23 }
 0x1bf   : > { %vm330_vm6 = vmor %vm328_vm5, %vm329_vm4 }
 0x1c0   : > { %v325_v25 = vsub.f32 1.0, %v324_v24 }
 0x1c2   : > { %v326_v27 = vmul.f32 %v512_v23, %v325_v25 }
 0x1c4   : > { %v327_v29 = vadd.f32 %v512_v23, %v326_v27 }
 0x1c6   : > { %v331_v31 = vsel %vm330_vm6, %v512_v23, %v327_v29 }
 0x1c7   : > { %v336_v32 = vsel %vm333_vm7, %v335_v30, %v331_v31 }
 0x1c8   : > { %v338_v33 = vperm.slane %v336_v32, 0 }
 0x1ca   : > { %343 = vperm.xlu0 %508, %v338_v33  }
 0x23c   : > { %v344_v37 = vpop.permute.xlu0 %343 }
 0x23d   : > { %v349_v38 = vperm.slane %v344_v37, %v348_v36 }
 0x23f   : > { %v351_v39 = vmul.f32 %v349_v38, %v243_v0 }
 0x241   : > { %352 = vst [vmem:[%s242_s12] sm:$0xff] %v351_v39 }
 0x242   : > { %570 = shalt.err (!%p567_p4)
}
 0x243   : > { %463 = dma.vmem_to_hbm [thread:$0]  (%p692_p11), %s368_s14, 128, %s370_s13, %s354_s15  }
 0x244 PF: > { %s381_s7 = sand.u32 1, %s597_s18   ;;  %p796_p7 = scmp.ge.s32.totalorder %s609_s21, 2 }
 0x245   : > { %s382_s26 = scalar_lea.sflag [#allocation4], %s381_s7 }
 0x246   : > { %p470_p5 = pnand %p796_p7, %p696_p12 }
 0x248   : > { %p471_p8 = pneg %p470_p5 }
 0x24a   : > { %592 = dma.done.wait (%p471_p8), %s382_s26, 128  }
 0x24b   : > { %594 = vsyncadd (%p471_p8), %s382_s26, 4294967168  ;;  %p18_p10 = scmp.ge.s32.totalorder %s667_s24, 4   ;;  %s797_s18 = smov %s601_s19 }
 0x24c   : > { %s798_s19 = smov %s605_s20  ;;  %s799_s20 = smov %s679_s27 }
 0x24d   : > { %s800_s21 = smov %s667_s24  ;;  %20 = sbr.rel (!%p18_p10) target bundleno = 5 (0x5), region = 85 }
 0x252   :  { %388 = vsyncpa [#allocation3], 1 }
 0x253   :  { %390 = vsyncpa [#allocation3 + $0x1], 1 }
 0x254   :  { %391 = vsyncpa [#allocation4], 1 }
 0x255   :  { %393 = vsyncpa [#allocation4 + $0x1], 1 }

</bundles_post_ra>
